<compile_context>
chip_gen: v6e
topology: v6e:2x2x1
jax: 0.10.0
libtpu: 0.0.40
codegen_flags: <defaults>
</compile_context>

<pallas_src>
import functools

import jax
import jax.numpy as jnp
from jax import lax
from jax.experimental import pallas as pl
from jax.experimental.pallas import tpu as pltpu

EPS = 1e-5      # PyTorch nn.LayerNorm default eps
PAD = 128       # lane width


def ae_kernel(x_ref, w1_ref, p1_ref, w2_ref, p2_ref, out_ref, *,
              enc_dim, in_dim):
    x = x_ref[...].astype(jnp.float32)

    # ----- encoder: Linear(38 -> 64, padded to 128) + ReLU + LayerNorm(64) ---
    h = jnp.dot(x, w1_ref[...], preferred_element_type=jnp.float32) + p1_ref[0:1, :]
    h = jnp.maximum(h, 0.0)
    # padded lanes of h are exactly 0, so full-width sums == valid-width sums
    inv_e = 1.0 / float(enc_dim)
    mu1 = jnp.sum(h, axis=-1, keepdims=True) * inv_e
    ms1 = jnp.sum(h * h, axis=-1, keepdims=True) * inv_e
    var1 = ms1 - mu1 * mu1
    enc = (h - mu1) * lax.rsqrt(var1 + EPS) * p1_ref[1:2, :] + p1_ref[2:3, :]
    # gamma/beta padded with zeros -> enc[:, enc_dim:] == 0

    # ----- decoder: Linear(64 -> 38, padded to 128) + LayerNorm(38) ----------
    d = jnp.dot(enc, w2_ref[...], preferred_element_type=jnp.float32) + p2_ref[0:1, :]
    inv_i = 1.0 / float(in_dim)
    mu2 = jnp.sum(d, axis=-1, keepdims=True) * inv_i
    ms2 = jnp.sum(d * d, axis=-1, keepdims=True) * inv_i
    var2 = ms2 - mu2 * mu2
    out_ref[...] = ((d - mu2) * lax.rsqrt(var2 + EPS) * p2_ref[1:2, :]
                    + p2_ref[2:3, :]).astype(out_ref.dtype)


def ae_forward(x, packed, *, in_dim, enc_dim, out_dim=1, tb=512):
    """Returns (decoded (B, in_dim), classification (B, out_dim))."""
    w1p, p1, w2p, p2, sig_bec = packed
    B = x.shape[0]
    if B < tb or B % tb != 0:
        tb = B                      # single full-array block for small batches
    grid = (B // tb,)

    out = pl.pallas_call(
        functools.partial(ae_kernel, enc_dim=enc_dim, in_dim=in_dim),
        out_shape=jax.ShapeDtypeStruct((B, PAD), jnp.float32),
        grid=grid,
        in_specs=[
            pl.BlockSpec((tb, in_dim), lambda i: (i, 0)),      # x (streams)
            pl.BlockSpec(w1p.shape, lambda i: (0, 0)),         # resident weights
            pl.BlockSpec(p1.shape, lambda i: (0, 0)),
            pl.BlockSpec(w2p.shape, lambda i: (0, 0)),
            pl.BlockSpec(p2.shape, lambda i: (0, 0)),
        ],
        out_specs=pl.BlockSpec((tb, PAD), lambda i: (i, 0)),   # lane-dense slab
        compiler_params=pltpu.CompilerParams(
            dimension_semantics=("parallel",)),
    )(x, w1p, p1, w2p, p2)

    decoded = out[:, :in_dim]
    # Classifier: LN over a size-1 feature == beta_c exactly; Dropout is
    # identity at inference -> sigmoid(beta_c), independent of x.
    cls = jnp.broadcast_to(sig_bec.reshape(1, out_dim), (B, out_dim))
    return decoded, cls


# ----------------------------- parameter helpers -----------------------------

def init_params(key, input_dim=38, encoding_dim=64, out_dim=1):
    """Raw params in (in, out) weight layout (== PyTorch W.T)."""
    ks = jax.random.split(key, 6)
    w1 = jax.random.normal(ks[0], (input_dim, encoding_dim), jnp.float32) * 0.1
    b1 = jax.random.normal(ks[1], (1, encoding_dim), jnp.float32) * 0.01
    g1 = jnp.ones((1, encoding_dim), jnp.float32)
    be1 = jnp.zeros((1, encoding_dim), jnp.float32)

    w2 = jax.random.normal(ks[2], (encoding_dim, input_dim), jnp.float32) * 0.1
    b2 = jax.random.normal(ks[3], (1, input_dim), jnp.float32) * 0.01
    g2 = jnp.ones((1, input_dim), jnp.float32)
    be2 = jnp.zeros((1, input_dim), jnp.float32)

    wc = jax.random.normal(ks[4], (encoding_dim, out_dim), jnp.float32) * 0.1
    bc = jax.random.normal(ks[5], (1, out_dim), jnp.float32) * 0.01
    gc = jnp.ones((1, out_dim), jnp.float32)
    bec = jnp.zeros((1, out_dim), jnp.float32)
    return (w1, b1, g1, be1, w2, b2, g2, be2, wc, bc, gc, bec)


def pack_params(raw, pad=PAD):
    (w1, b1, g1, be1, w2, b2, g2, be2, wc, bc, gc, bec) = raw
    in_dim, enc_dim = w1.shape

    w1p = jnp.zeros((in_dim, pad), jnp.float32).at[:, :enc_dim].set(w1)
    p1 = (jnp.zeros((3, pad), jnp.float32)
          .at[0, :enc_dim].set(b1[0])
          .at[1, :enc_dim].set(g1[0])
          .at[2, :enc_dim].set(be1[0]))

    w2p = jnp.zeros((pad, pad), jnp.float32).at[:enc_dim, :in_dim].set(w2)
    p2 = (jnp.zeros((3, pad), jnp.float32)
          .at[0, :in_dim].set(b2[0])
          .at[1, :in_dim].set(g2[0])
          .at[2, :in_dim].set(be2[0]))

    # wc, bc, gc drop out of the math: LN over 1 feature -> beta_c exactly.
    sig_bec = jax.nn.sigmoid(bec)
    return (w1p, p1, w2p, p2, sig_bec)


# --------------------------------- reference ---------------------------------

def _ln(h, gamma, beta):
    mu = jnp.mean(h, axis=-1, keepdims=True)
    var = jnp.mean((h - mu) ** 2, axis=-1, keepdims=True)
    return (h - mu) * lax.rsqrt(var + EPS) * gamma + beta


def _reference(x, raw):
    (w1, b1, g1, be1, w2, b2, g2, be2, wc, bc, gc, bec) = raw
    h = jnp.maximum(x @ w1 + b1, 0.0)
    enc = _ln(h, g1, be1)
    dec = _ln(enc @ w2 + b2, g2, be2)
    c = _ln(enc @ wc + bc, gc, bec)
    return dec, jax.nn.sigmoid(c)


if __name__ == "__main__":
    key = jax.random.PRNGKey(0)
    kx, kp = jax.random.split(key)

    B, INPUT_DIM, ENC_DIM, OUT_DIM = 8, 38, 64, 1
    x = jax.random.normal(kx, (B, INPUT_DIM), jnp.float32)
    raw = init_params(kp, INPUT_DIM, ENC_DIM, OUT_DIM)
    packed = pack_params(raw)

    decoded, cls = ae_forward(x, packed, in_dim=INPUT_DIM, enc_dim=ENC_DIM,
                              out_dim=OUT_DIM)
    jax.block_until_ready((decoded, cls))

    ref_dec, ref_cls = _reference(x, raw)
    assert decoded.shape == (B, INPUT_DIM) and cls.shape == (B, OUT_DIM)
    assert jnp.allclose(decoded, ref_dec, atol=1e-4, rtol=1e-4)
    assert jnp.allclose(cls, ref_cls, atol=1e-4, rtol=1e-4)

    print("KERNEL_OK")
</pallas_src>

<mosaic_0001>
module attributes {stable_mosaic.version = 11 : i64} {
  func.func @ae_kernel(%arg0: i32, %arg1: memref<8x38xf32, #tpu.memory_space<vmem>>, %arg2: memref<38x128xf32, #tpu.memory_space<vmem>>, %arg3: memref<3x128xf32, #tpu.memory_space<vmem>>, %arg4: memref<128x128xf32, #tpu.memory_space<vmem>>, %arg5: memref<3x128xf32, #tpu.memory_space<vmem>>, %arg6: memref<8x128xf32, #tpu.memory_space<vmem>>) attributes {dimension_semantics = [#tpu.dimension_semantics<parallel>], iteration_bounds = array<i64: 1>, scalar_prefetch = 0 : i64, scratch_operands = 0 : i64, tpu.core_type = #tpu.core_type<tc>, window_params = [{transform_indices = @transform_0, window_bounds = array<i64: 8, 38>}, {pipeline_mode = #tpu.pipeline_mode<synchronous>, transform_indices = @transform_1, window_bounds = array<i64: 38, 128>}, {pipeline_mode = #tpu.pipeline_mode<synchronous>, transform_indices = @transform_2, window_bounds = array<i64: 3, 128>}, {pipeline_mode = #tpu.pipeline_mode<synchronous>, transform_indices = @transform_3, window_bounds = array<i64: 128, 128>}, {pipeline_mode = #tpu.pipeline_mode<synchronous>, transform_indices = @transform_4, window_bounds = array<i64: 3, 128>}, {transform_indices = @transform_5, window_bounds = array<i64: 8, 128>}]} {
    %c0 = arith.constant 0 : index
    %c0_0 = arith.constant 0 : index
    %0 = vector.load %arg1[%c0, %c0_0] : memref<8x38xf32, #tpu.memory_space<vmem>>, vector<8x38xf32>
    %c0_1 = arith.constant 0 : index
    %c0_2 = arith.constant 0 : index
    %1 = vector.load %arg2[%c0_1, %c0_2] : memref<38x128xf32, #tpu.memory_space<vmem>>, vector<38x128xf32>
    %cst = arith.constant dense<0.000000e+00> : vector<8x128xf32>
    %2 = tpu.matmul %0, %1, %cst {dimension_numbers = #tpu.dot_dimension_numbers<[1], [0], [0], [1], [0, 0, 1, 1], [], []>} : vector<8x38xf32>, vector<38x128xf32>, vector<8x128xf32> -> vector<8x128xf32>
    %c0_3 = arith.constant 0 : index
    %c0_4 = arith.constant 0 : index
    %3 = vector.load %arg3[%c0_3, %c0_4] : memref<3x128xf32, #tpu.memory_space<vmem>>, vector<1x128xf32>
    %4 = vector.broadcast %3 : vector<1x128xf32> to vector<8x128xf32>
    %5 = arith.addf %2, %4 : vector<8x128xf32>
    %cst_5 = arith.constant 0.000000e+00 : f32
    %6 = vector.broadcast %cst_5 : f32 to vector<8x128xf32>
    %7 = arith.maximumf %5, %6 : vector<8x128xf32>
    %cst_6 = arith.constant dense<0.000000e+00> : vector<8xf32>
    %8 = vector.multi_reduction <add>, %7, %cst_6 [1] : vector<8x128xf32> to vector<8xf32>
    %9 = vector.shape_cast %8 : vector<8xf32> to vector<8x1xf32>
    %cst_7 = arith.constant 1.562500e-02 : f32
    %10 = vector.broadcast %cst_7 : f32 to vector<8x1xf32>
    %11 = arith.mulf %9, %10 : vector<8x1xf32>
    %12 = arith.mulf %7, %7 : vector<8x128xf32>
    %cst_8 = arith.constant dense<0.000000e+00> : vector<8xf32>
    %13 = vector.multi_reduction <add>, %12, %cst_8 [1] : vector<8x128xf32> to vector<8xf32>
    %14 = vector.shape_cast %13 : vector<8xf32> to vector<8x1xf32>
    %cst_9 = arith.constant 1.562500e-02 : f32
    %15 = vector.broadcast %cst_9 : f32 to vector<8x1xf32>
    %16 = arith.mulf %14, %15 : vector<8x1xf32>
    %17 = arith.mulf %11, %11 : vector<8x1xf32>
    %18 = arith.subf %16, %17 : vector<8x1xf32>
    %19 = vector.broadcast %11 : vector<8x1xf32> to vector<8x128xf32>
    %20 = arith.subf %7, %19 : vector<8x128xf32>
    %cst_10 = arith.constant 9.99999974E-6 : f32
    %21 = vector.broadcast %cst_10 : f32 to vector<8x1xf32>
    %22 = arith.addf %18, %21 : vector<8x1xf32>
    %23 = math.rsqrt %22 : vector<8x1xf32>
    %24 = vector.broadcast %23 : vector<8x1xf32> to vector<8x128xf32>
    %25 = arith.mulf %20, %24 : vector<8x128xf32>
    %c1 = arith.constant 1 : index
    %c0_11 = arith.constant 0 : index
    %26 = vector.load %arg3[%c1, %c0_11] : memref<3x128xf32, #tpu.memory_space<vmem>>, vector<1x128xf32>
    %27 = vector.broadcast %26 : vector<1x128xf32> to vector<8x128xf32>
    %28 = arith.mulf %25, %27 : vector<8x128xf32>
    %c2 = arith.constant 2 : index
    %c0_12 = arith.constant 0 : index
    %29 = vector.load %arg3[%c2, %c0_12] : memref<3x128xf32, #tpu.memory_space<vmem>>, vector<1x128xf32>
    %30 = vector.broadcast %29 : vector<1x128xf32> to vector<8x128xf32>
    %31 = arith.addf %28, %30 : vector<8x128xf32>
    %c0_13 = arith.constant 0 : index
    %c0_14 = arith.constant 0 : index
    %32 = vector.load %arg4[%c0_13, %c0_14] : memref<128x128xf32, #tpu.memory_space<vmem>>, vector<128x128xf32>
    %cst_15 = arith.constant dense<0.000000e+00> : vector<8x128xf32>
    %33 = tpu.matmul %31, %32, %cst_15 {dimension_numbers = #tpu.dot_dimension_numbers<[1], [0], [0], [1], [0, 0, 1, 1], [], []>} : vector<8x128xf32>, vector<128x128xf32>, vector<8x128xf32> -> vector<8x128xf32>
    %c0_16 = arith.constant 0 : index
    %c0_17 = arith.constant 0 : index
    %34 = vector.load %arg5[%c0_16, %c0_17] : memref<3x128xf32, #tpu.memory_space<vmem>>, vector<1x128xf32>
    %35 = vector.broadcast %34 : vector<1x128xf32> to vector<8x128xf32>
    %36 = arith.addf %33, %35 : vector<8x128xf32>
    %cst_18 = arith.constant dense<0.000000e+00> : vector<8xf32>
    %37 = vector.multi_reduction <add>, %36, %cst_18 [1] : vector<8x128xf32> to vector<8xf32>
    %38 = vector.shape_cast %37 : vector<8xf32> to vector<8x1xf32>
    %cst_19 = arith.constant 0.0263157897 : f32
    %39 = vector.broadcast %cst_19 : f32 to vector<8x1xf32>
    %40 = arith.mulf %38, %39 : vector<8x1xf32>
    %41 = arith.mulf %36, %36 : vector<8x128xf32>
    %cst_20 = arith.constant dense<0.000000e+00> : vector<8xf32>
    %42 = vector.multi_reduction <add>, %41, %cst_20 [1] : vector<8x128xf32> to vector<8xf32>
    %43 = vector.shape_cast %42 : vector<8xf32> to vector<8x1xf32>
    %cst_21 = arith.constant 0.0263157897 : f32
    %44 = vector.broadcast %cst_21 : f32 to vector<8x1xf32>
    %45 = arith.mulf %43, %44 : vector<8x1xf32>
    %46 = arith.mulf %40, %40 : vector<8x1xf32>
    %47 = arith.subf %45, %46 : vector<8x1xf32>
    %48 = vector.broadcast %40 : vector<8x1xf32> to vector<8x128xf32>
    %49 = arith.subf %36, %48 : vector<8x128xf32>
    %cst_22 = arith.constant 9.99999974E-6 : f32
    %50 = vector.broadcast %cst_22 : f32 to vector<8x1xf32>
    %51 = arith.addf %47, %50 : vector<8x1xf32>
    %52 = math.rsqrt %51 : vector<8x1xf32>
    %53 = vector.broadcast %52 : vector<8x1xf32> to vector<8x128xf32>
    %54 = arith.mulf %49, %53 : vector<8x128xf32>
    %c1_23 = arith.constant 1 : index
    %c0_24 = arith.constant 0 : index
    %55 = vector.load %arg5[%c1_23, %c0_24] : memref<3x128xf32, #tpu.memory_space<vmem>>, vector<1x128xf32>
    %56 = vector.broadcast %55 : vector<1x128xf32> to vector<8x128xf32>
    %57 = arith.mulf %54, %56 : vector<8x128xf32>
    %c2_25 = arith.constant 2 : index
    %c0_26 = arith.constant 0 : index
    %58 = vector.load %arg5[%c2_25, %c0_26] : memref<3x128xf32, #tpu.memory_space<vmem>>, vector<1x128xf32>
    %59 = vector.broadcast %58 : vector<1x128xf32> to vector<8x128xf32>
    %60 = arith.addf %57, %59 : vector<8x128xf32>
    %c0_27 = arith.constant 0 : index
    %c0_28 = arith.constant 0 : index
    %61 = vector.load %arg6[%c0_27, %c0_28] : memref<8x128xf32, #tpu.memory_space<vmem>>, vector<8x128xf32>
    tpu.vector_store %arg6[%c0_27, %c0_28], %60 {strides = array<i32>} : memref<8x128xf32, #tpu.memory_space<vmem>>, vector<8x128xf32>,
    return
  }
  func.func @transform_0(%arg0: i32) -> (i32, i32) {
    %c0_i32 = arith.constant 0 : i32
    %c0_i32_0 = arith.constant 0 : i32
    return %arg0, %c0_i32 : i32, i32
  }
  func.func @transform_1(%arg0: i32) -> (i32, i32) {
    %c0_i32 = arith.constant 0 : i32
    %c0_i32_0 = arith.constant 0 : i32
    %c0_i32_1 = arith.constant 0 : i32
    return %c0_i32, %c0_i32_0 : i32, i32
  }
  func.func @transform_2(%arg0: i32) -> (i32, i32) {
    %c0_i32 = arith.constant 0 : i32
    %c0_i32_0 = arith.constant 0 : i32
    %c0_i32_1 = arith.constant 0 : i32
    return %c0_i32, %c0_i32_0 : i32, i32
  }
  func.func @transform_3(%arg0: i32) -> (i32, i32) {
    %c0_i32 = arith.constant 0 : i32
    %c0_i32_0 = arith.constant 0 : i32
    %c0_i32_1 = arith.constant 0 : i32
    return %c0_i32, %c0_i32_0 : i32, i32
  }
  func.func @transform_4(%arg0: i32) -> (i32, i32) {
    %c0_i32 = arith.constant 0 : i32
    %c0_i32_0 = arith.constant 0 : i32
    %c0_i32_1 = arith.constant 0 : i32
    return %c0_i32, %c0_i32_0 : i32, i32
  }
  func.func @transform_5(%arg0: i32) -> (i32, i32) {
    %c0_i32 = arith.constant 0 : i32
    %c0_i32_0 = arith.constant 0 : i32
    return %arg0, %c0_i32 : i32, i32
  }
}

</mosaic_0001>

<bundles_post_ra>
// kernel: tpu_custom_call.1
= control target key start
LH: loop header
LB: loop body
LE: loop exit
PB: predicated region body
PF: predicated region fallthrough
CT: control target
= control target key end

     0   :  { %10 = vsyncpa [#allocation3], 0  ;;  %s613_s0 = inlined_call_operand.hbm [shape: f32[8,38], index: 0, kind: input, shape index: {}]   ;;  %s614_s1 = inlined_call_operand.hbm [shape: f32[38,128], index: 1, kind: input, shape index: {}]   ;;  %s615_s2 = inlined_call_operand.hbm [shape: f32[3,128], index: 2, kind: input, shape index: {}]   ;;  %s616_s3 = inlined_call_operand.hbm [shape: f32[128,128], index: 3, kind: input, shape index: {}]   ;;  %s617_s4 = inlined_call_operand.vmem [shape: f32[3,128], index: 4, kind: input, shape index: {}]   ;;  %s618_s5 = inlined_call_operand.hbm [shape: f32[8,128], index: 5, kind: output, shape index: {}]  }
   0x1   :  { %11 = vsyncpa [#allocation6], 0 }
   0x2   :  { %12 = vsyncpa [#allocation9], 0 }
   0x3   :  { %13 = vsyncpa [#allocation4], 0  ;;  %s521_s18 = smov [#allocation5]  }
   0x4   :  { %s29_s19 = sshll.u32 %s521_s18, 4  ;;  %s30_s19 = int_to_ptr.vmem [resolvable:$true] %s29_s19 }
   0x5   :  { %s421_s20 = scalar_lea.vmem %s30_s19, 640  ;;  %p426_p1 = scmp.lt.s32.totalorder %s30_s19, %s30_s19 }
   0x6   :  { %p422_p0 = scmp.ne.s32.totalorder %s30_s19, %s421_s20  ;;  %p427_p2 = scmp.lt.s32.totalorder %s421_s20, %s421_s20 }
   0x8   :  { %p428_p3 = por %p427_p2, %p426_p1 }
   0xa   :  { %p429_p4 = pnand %p428_p3, %p422_p0 }
   0xc   :  { %432 = shalt.err (!%p429_p4)
}
   0xd   :  { %s522_s21 = smov 128   ;;  %s523_s22 = smov 8  }
   0xe   :  { %35 = dma.hbm_to_vmem [thread:$0]  %s614_s1, 640, %s30_s19, [#allocation6], %s522_s21, %s522_s21, %s523_s22  }
   0xf   :  { %s524_s25 = smov [#allocation2]   ;;  %s525_s27 = smov [#allocation7]  }
  0x10   :  { %s20_s26 = sshll.u32 %s524_s25, 4  ;;  %s42_s28 = sshll.u32 %s525_s27, 4  ;;  %s21_s26 = int_to_ptr.vmem [resolvable:$true] %s20_s26  ;;  %s43_s28 = int_to_ptr.vmem [resolvable:$true] %s42_s28 }
  0x11   :  { %s441_s29 = scalar_lea.vmem %s21_s26, 128  ;;  %p446_p6 = scmp.lt.s32.totalorder %s21_s26, %s21_s26 }
  0x12   :  { %p442_p5 = scmp.ne.s32.totalorder %s21_s26, %s441_s29  ;;  %p447_p7 = scmp.lt.s32.totalorder %s441_s29, %s441_s29 }
  0x14   :  { %p448_p8 = por %p447_p7, %p446_p6 }
  0x16   :  { %p449_p9 = pnand %p448_p8, %p442_p5 }
  0x18   :  { %452 = shalt.err (!%p449_p9)
}
  0x19   :  { %23 = dma.hbm_to_vmem [thread:$0]  %s613_s0, 128, %s21_s26, [#allocation3]  }
  0x1a   :  { %s461_s7 = scalar_lea.vmem %s43_s28, 64  ;;  %p466_p11 = scmp.lt.s32.totalorder %s43_s28, %s43_s28 }
  0x1b   :  { %p462_p10 = scmp.ne.s32.totalorder %s43_s28, %s461_s7  ;;  %p467_p12 = scmp.lt.s32.totalorder %s461_s7, %s461_s7 }
  0x1d   :  { %p468_p13 = por %p467_p12, %p466_p11 }
  0x1f   :  { %p469_p0 = pnand %p468_p13, %p462_p10 }
  0x21   :  { %472 = shalt.err (!%p469_p0)
}
  0x22   :  { %45 = dma.hbm_to_vmem [thread:$0]  %s615_s2, 64, %s43_s28, [#allocation6]  }
  0x23   :  { %s526_s9 = smov [#allocation8]  }
  0x24   :  { %s51_s10 = sshll.u32 %s526_s9, 4  ;;  %s52_s10 = int_to_ptr.vmem [resolvable:$true] %s51_s10 }
  0x25   :  { %s481_s11 = scalar_lea.vmem %s52_s10, 2048  ;;  %p486_p2 = scmp.lt.s32.totalorder %s52_s10, %s52_s10 }
  0x26   :  { %p482_p1 = scmp.ne.s32.totalorder %s52_s10, %s481_s11  ;;  %p487_p3 = scmp.lt.s32.totalorder %s481_s11, %s481_s11 }
  0x28   :  { %p488_p4 = por %p487_p3, %p486_p2 }
  0x2a   :  { %p489_p5 = pnand %p488_p4, %p482_p1 }
  0x2c   :  { %492 = shalt.err (!%p489_p5)
}
  0x2d   :  { %57 = dma.hbm_to_vmem [thread:$0]  %s616_s3, 2048, %s52_s10, [#allocation9], %s522_s21, %s522_s21, %s523_s22  }
  0x2e   :  { %513 = dma.done.wait [#allocation3], 128  }
  0x2f   :  { %514 = vsyncadd [#allocation3], 4294967168 }
  0x30   :  { %515 = dma.done.wait [#allocation6], 704  }
  0x31   :  { %516 = vsyncadd [#allocation6], 4294966592 }
  0x32   :  { %517 = dma.done.wait [#allocation9], 2048  }
  0x33   :  { %518 = vsyncadd [#allocation9], 4294965248  ;;  %v527_v0 = vmov 0.0   ;;  %vm528_vm0 = vmmov 0   ;;  %vm87_vm1 = vcmask 1045504   ;;  %v76_v2 = vld [vmem:[#allocation5 + $0x18] sm:$0xff] }
  0x34   :  { %352 = vmatprep.subr.mxu0 %v527_v0  ;;  %362 = vmatprep.mubr.msk.f32.mxu0 %vm528_vm0, %v527_v0  ;;  %v77_v1 = vld [vmem:[#allocation5 + $0x20] sm:$0x3f]  ;;  %v75_v3 = vld [vmem:[#allocation5 + $0x10] sm:$0xff]  ;;  %v74_v4 = vld [vmem:[#allocation5 + $0x8] sm:$0xff]  ;;  %vm83_vm2 = vcmask 310272   ;;  %s529_s17 = smov [#allocation10]  }
  0x35   :  { %365 = vmatprep.subr.mxu1 %v527_v0  ;;  %397 = vmatprep.mubr.msk.f32.mxu1 %vm528_vm0, %v527_v0  ;;  %v73_v5 = vld [vmem:[#allocation5] sm:$0xff]  ;;  %v72_v6 = vld [vmem:[#allocation2] sm:$0xff]  ;;  %v321_v8 = vld [vmem:[#allocation7] ss:$0 sm:$0xff]  ;;  %s310_s18 = sshll.u32 %s529_s17, 4  ;;  %s311_s18 = int_to_ptr.vmem [resolvable:$true] %s310_s18 }
  0x36   :  { %353 = vmatpush3.msk.msra.mxu0 %vm87_vm1, %v77_v1  ;;  %v202_v7 = vld [vmem:[#allocation8 + $0x78] sm:$0xff]  ;;  %v201_v14 = vld [vmem:[#allocation8 + $0x70] sm:$0xff]  ;;  %v200_v15 = vld [vmem:[#allocation8 + $0x68] sm:$0xff]  ;;  %s493_s19 = scalar_lea.vmem %s311_s18, 128  ;;  %p498_p7 = scmp.lt.s32.totalorder %s311_s18, %s311_s18 }
  0x37   :  { %354 = vmatprep.subr.mxu0 %v527_v0  ;;  %366 = vmatpush3.msra.mxu1 %v202_v7  ;;  %v199_v16 = vld [vmem:[#allocation8 + $0x60] sm:$0xff]  ;;  %v198_v17 = vld [vmem:[#allocation8 + $0x58] sm:$0xff]  ;;  %v197_v18 = vld [vmem:[#allocation8 + $0x50] sm:$0xff]  ;;  %p494_p6 = scmp.ne.s32.totalorder %s311_s18, %s493_s19  ;;  %p499_p8 = scmp.lt.s32.totalorder %s493_s19, %s493_s19 }
  0x38   :  { %355 = vmatpush3.msra.mxu0 %v76_v2  ;;  %367 = vmatprep.subr.mxu1 %v527_v0  ;;  %v196_v19 = vld [vmem:[#allocation8 + $0x48] sm:$0xff]  ;;  %v195_v20 = vld [vmem:[#allocation8 + $0x40] sm:$0xff]  ;;  %v194_v21 = vld [vmem:[#allocation8 + $0x38] sm:$0xff] }
  0x39   :  { %356 = vmatprep.subr.mxu0 %v527_v0  ;;  %368 = vmatpush3.msra.mxu1 %v201_v14  ;;  %v193_v22 = vld [vmem:[#allocation8 + $0x30] sm:$0xff]  ;;  %v192_v23 = vld [vmem:[#allocation8 + $0x28] sm:$0xff]  ;;  %v191_v24 = vld [vmem:[#allocation8 + $0x20] sm:$0xff]  ;;  %p500_p9 = por %p499_p8, %p498_p7 }
  0x3a   :  { %357 = vmatpush3.msra.mxu0 %v75_v3  ;;  %369 = vmatprep.subr.mxu1 %v527_v0  ;;  %v190_v25 = vld [vmem:[#allocation8 + $0x18] sm:$0xff]  ;;  %v189_v26 = vld [vmem:[#allocation8 + $0x10] sm:$0xff]  ;;  %v188_v27 = vld [vmem:[#allocation8 + $0x8] sm:$0xff] }
  0x3b   :  { %358 = vmatprep.subr.mxu0 %v527_v0  ;;  %370 = vmatpush3.msra.mxu1 %v200_v15  ;;  %v187_v28 = vld [vmem:[#allocation8] sm:$0xff]  ;;  %v324_v38 = vld [vmem:[#allocation7 + $0x1] ss:$0 sm:$0xff]  ;;  %v325_v40 = vld [vmem:[#allocation7 + $0x2] ss:$0 sm:$0xff]  ;;  %p501_p10 = pnand %p500_p9, %p494_p6 }
  0x3c   :  { %359 = vmatpush3.msra.mxu0 %v74_v4  ;;  %371 = vmatprep.subr.mxu1 %v527_v0  ;;  %v326_v43 = vld [vmem:[%s617_s4] ss:$0 sm:$0xff]  ;;  %v327_v57 = vld [vmem:[%s617_s4 + $0x1] ss:$0 sm:$0xff]  ;;  %v328_v59 = vld [vmem:[%s617_s4 + $0x2] ss:$0 sm:$0xff] }
  0x3d   :  { %360 = vmatprep.subr.mxu0 %v527_v0  ;;  %372 = vmatpush3.msra.mxu1 %v199_v16 }
  0x3e   :  { %361 = vmatpush3.msra.mxu0 %v73_v5  ;;  %373 = vmatprep.subr.mxu1 %v527_v0 }
  0x3f   :  { %363 = vmatmul.mubr.msk.f32.vlgmr.msra.gmra.mxu0 %vm83_vm2, %v72_v6  ;;  %374 = vmatpush3.msra.mxu1 %v198_v17 }
  0x40   :  { %375 = vmatprep.subr.mxu1 %v527_v0 }
  0x41   :  { %376 = vmatpush3.msra.mxu1 %v197_v18 }
  0x42   :  { %377 = vmatprep.subr.mxu1 %v527_v0 }
  0x43   :  { %378 = vmatpush3.msra.mxu1 %v196_v19 }
  0x44   :  { %379 = vmatprep.subr.mxu1 %v527_v0 }
  0x45   :  { %380 = vmatpush3.msra.mxu1 %v195_v20 }
  0x46   :  { %381 = vmatprep.subr.mxu1 %v527_v0 }
  0x47   :  { %382 = vmatpush3.msra.mxu1 %v194_v21 }
  0x48   :  { %383 = vmatprep.subr.mxu1 %v527_v0 }
  0x49   :  { %384 = vmatpush3.msra.mxu1 %v193_v22 }
  0x4a   :  { %385 = vmatprep.subr.mxu1 %v527_v0 }
  0x4b   :  { %386 = vmatpush3.msra.mxu1 %v192_v23 }
  0x4c   :  { %387 = vmatprep.subr.mxu1 %v527_v0 }
  0x4d   :  { %388 = vmatpush3.msra.mxu1 %v191_v24 }
  0x4e   :  { %389 = vmatprep.subr.mxu1 %v527_v0 }
  0x4f   :  { %390 = vmatpush3.msra.mxu1 %v190_v25 }
  0x50   :  { %391 = vmatprep.subr.mxu1 %v527_v0 }
  0x51   :  { %392 = vmatpush3.msra.mxu1 %v189_v26 }
  0x52   :  { %393 = vmatprep.subr.mxu1 %v527_v0 }
  0x53   :  { %394 = vmatpush3.msra.mxu1 %v188_v27 }
  0x54   :  { %395 = vmatprep.subr.mxu1 %v527_v0 }
  0x55   :  { %396 = vmatpush3.msra.mxu1 %v187_v28 }
  0xff   :  { %v157_v9 = vpop.f32.mrf.mxu0 }
 0x100   :  { %v158_v10 = vadd.f32 %v321_v8, %v157_v9 }
 0x101   :  { %v364_v11 = vpop.f32.mrf.mxu0 }
 0x102   :  { %v161_v12 = vmax.f32 %v158_v10, 0.0 }
 0x104   :  { %162 = vadd.xlane.f32.xlu0 %v161_v12  ;;  %v165_v13 = vmul.f32 %v161_v12, %v161_v12 }
 0x108   :  { %166 = vadd.xlane.f32.xlu0 %v165_v13 }
 0x18d   :  { %v163_v29 = vpop.xlane.xlu0 %162 }
 0x18e   :  { %v164_v30 = vmul.f32 0.015625, %v163_v29 }
 0x190   :  { %v169_v32 = vmul.f32 %v164_v30, %v164_v30  ;;  %v171_v36 = vsub.f32 %v161_v12, %v164_v30 }
 0x191   :  { %v167_v31 = vpop.xlane.xlu0 %166 }
 0x192   :  { %v168_v33 = vmul.f32 0.015625, %v167_v31 }
 0x194   :  { %v170_v34 = vsub.f32 %v168_v33, %v169_v32 }
 0x196   :  { %v172_v35 = vadd.f32 1e-05, %v170_v34 }
 0x198   :  { %409 = vrsqrt.f32 %v172_v35 }
 0x1a5   :  { %v410_v37 = vpop.eup %409 }
 0x1a6   :  { %v174_v39 = vmul.f32 %v410_v37, %v171_v36 }
 0x1a8   :  { %v180_v41 = vmul.f32 %v324_v38, %v174_v39 }
 0x1aa   :  { %v186_v42 = vadd.f32 %v325_v40, %v180_v41 }
 0x1ac   :  { %398 = vmatmul.mubr.f32.vlgmr.msra.gmra.mxu1 %v186_v42 }
 0x26c   :  { %v274_v44 = vpop.f32.mrf.mxu1 }
 0x26d   :  { %v275_v45 = vadd.f32 %v326_v43, %v274_v44 }
 0x26e   :  { %v399_v46 = vpop.f32.mrf.mxu1 }
 0x26f   :  { %278 = vadd.xlane.f32.xlu1 %v275_v45  ;;  %v281_v47 = vmul.f32 %v275_v45, %v275_v45 }
 0x273   :  { %282 = vadd.xlane.f32.xlu1 %v281_v47 }
 0x2f8   :  { %v279_v48 = vpop.xlane.xlu1 %278 }
 0x2f9   :  { %v280_v49 = vmul.f32 0.02631579, %v279_v48 }
 0x2fb   :  { %v285_v51 = vmul.f32 %v280_v49, %v280_v49  ;;  %v287_v55 = vsub.f32 %v275_v45, %v280_v49 }
 0x2fc   :  { %v283_v50 = vpop.xlane.xlu1 %282 }
 0x2fd   :  { %v284_v52 = vmul.f32 0.02631579, %v283_v50 }
 0x2ff   :  { %v286_v53 = vsub.f32 %v284_v52, %v285_v51 }
 0x301   :  { %v288_v54 = vadd.f32 1e-05, %v286_v53 }
 0x303   :  { %411 = vrsqrt.f32 %v288_v54 }
 0x310   :  { %v412_v56 = vpop.eup %411 }
 0x311   :  { %v290_v58 = vmul.f32 %v412_v56, %v287_v55 }
 0x313   :  { %v296_v60 = vmul.f32 %v327_v57, %v290_v58 }
 0x315   :  { %v302_v61 = vadd.f32 %v328_v59, %v296_v60 }
 0x317   :  { %303 = vst [vmem:[#allocation10] sm:$0xff] %v302_v61 }
 0x318   :  { %504 = shalt.err (!%p501_p10)
}
 0x319   :  { %313 = dma.vmem_to_hbm [thread:$0]  %s311_s18, 128, %s618_s5, [#allocation4]  }
 0x31a   :  { %519 = dma.done.wait [#allocation4], 128  }
 0x31b   :  { %520 = vsyncadd [#allocation4], 4294967168 }
 0x31c   :  { %317 = vsyncpa [#allocation3], 1 }
 0x31d   :  { %318 = vsyncpa [#allocation6], 1 }
 0x31e   :  { %319 = vsyncpa [#allocation9], 1 }
 0x31f   :  { %320 = vsyncpa [#allocation4], 1 }

</bundles_post_ra>
